<compile_context>
chip_gen: v7x
topology: tpu7x:2x2x1
jax: 0.10.0
libtpu: 0.0.40
codegen_flags: <defaults>
</compile_context>

<pallas_src>
import jax
import jax.numpy as jnp
from jax.experimental import pallas as pl
from jax.experimental.pallas import tpu as pltpu


C_PAD = 128  # lane-dense logits width (real classes live in the first C lanes)


# ----------------------------- fused Pallas kernel ---------------------------

def fused_gcn_kernel(edge_ref, x_ref,
                     w1_ref, b1_ref, w2_ref, b2_ref,
                     wfr_ref, wfc_ref, bf_ref,
                     logits_ref, loss_ref):
    e = edge_ref.shape[0]
    n = x_ref.shape[0]
    c_pad = bf_ref.shape[1]
    f32 = jnp.float32

    # --- unpack edge data (single [E,3] int32 operand: row | col | label) ----
    row_idx = edge_ref[:, 0:1]                                          # [E,1]
    col_idx = edge_ref[:, 1:2]                                          # [E,1]
    lab_idx = edge_ref[:, 2:3]                                          # [E,1]

    # --- GCN-normalized adjacency (with self loops) from edge lists ----------
    # one-hot indicators built with iota compares (VPU only, no gather/scatter)
    node_iota = jax.lax.broadcasted_iota(jnp.int32, (e, n), 1)          # [E,N]
    sel_row = (node_iota == row_idx).astype(f32)                        # [E,N]
    sel_col = (node_iota == col_idx).astype(f32)                        # [E,N]

    # degree(row) + self loop, matching torch degree(row, N) + add_self_loops
    deg = jnp.sum(sel_row, axis=0, keepdims=True) + 1.0                 # [1,N]
    dinv = 1.0 / jnp.sqrt(deg)                                          # [1,N]

    # Fold dinv directly into the one-hots:
    #   M[i,j] = sum_e [col[e]==i]*dinv[i] * [row[e]==j]*dinv[j] + (i==j)*dinv[i]^2
    sel_row_s = sel_row * dinv                                          # [E,N]
    sel_col_s = sel_col * dinv                                          # [E,N]
    m = jax.lax.dot_general(sel_col_s, sel_row_s,
                            (((0,), (0,)), ((), ())),
                            preferred_element_type=f32)                 # [N,N]
    eye = (jax.lax.broadcasted_iota(jnp.int32, (n, n), 0) ==
           jax.lax.broadcasted_iota(jnp.int32, (n, n), 1)).astype(f32)
    m = m + eye * (dinv * dinv)
    # TODO(synk): at large N build only the (tm, N) slab of M per grid step and
    # add the diagonal term just for rows inside the slab (skip the full eye).

    # --- gcn1 / gcn2:  h = M @ (x @ W + b)   (weights pre-transposed) --------
    h1 = jnp.dot(x_ref[...], w1_ref[...], preferred_element_type=f32) + b1_ref[...]
    h1 = jnp.dot(m, h1, preferred_element_type=f32)
    h2 = jnp.dot(h1, w2_ref[...], preferred_element_type=f32) + b2_ref[...]
    h2 = jnp.dot(m, h2, preferred_element_type=f32)

    # --- edge-pair readout + fc (split weight, no concat, lane-dense out) ----
    x_row = jnp.dot(sel_row, h2, preferred_element_type=f32)            # h2[row] [E,H]
    x_col = jnp.dot(sel_col, h2, preferred_element_type=f32)            # h2[col] [E,H]
    logits = (jnp.dot(x_row, wfr_ref[...], preferred_element_type=f32) +
              jnp.dot(x_col, wfc_ref[...], preferred_element_type=f32) +
              bf_ref[...])                                              # [E,C_PAD]
    logits_ref[...] = logits                                            # unmasked vst

    # --- mean softmax cross-entropy over padded width (pad logits = -1e30,
    #     so exp() underflows to 0 and the result matches the C-wide CE) ------
    onehot = (jax.lax.broadcasted_iota(jnp.int32, (e, c_pad), 1) ==
              lab_idx).astype(f32)                                      # [E,C_PAD]
    mx = jnp.max(logits, axis=-1, keepdims=True)
    lse = jnp.log(jnp.sum(jnp.exp(logits - mx), axis=-1, keepdims=True)) + mx
    picked = jnp.sum(onehot * logits, axis=-1, keepdims=True)
    loss_ref[...] = jnp.mean(lse - picked, axis=0, keepdims=True)       # [1,1]


# ------------------------------- JAX wrapper ----------------------------------

def gcn_forward(params, index, label, sentence_mask, features):
    # sentence_mask is accepted for API parity; the original torch forward does
    # not use it in the loss either.
    del sentence_mask
    row, col = index
    n, f = features.shape
    e = row.shape[0]
    h = params["w1"].shape[0]
    c = params["wf"].shape[0]

    # single packed int32 edge operand: [E, 3] = (row | col | label)
    edge_data = jnp.stack([row.astype(jnp.int32),
                           col.astype(jnp.int32),
                           label.astype(jnp.int32)], axis=1)            # [E,3]

    # host-side layout plumbing: pre-transpose weights, pre-split fc weight,
    # pad the class dim to a lane-dense 128 (padded bias = -1e30 so the padded
    # columns vanish in the in-kernel softmax).
    w1t = params["w1"].T                                                # [F, H]
    w2t = params["w2"].T                                                # [H, H]
    wfr = jnp.zeros((h, C_PAD), jnp.float32).at[:, :c].set(params["wf"][:, :h].T)
    wfc = jnp.zeros((h, C_PAD), jnp.float32).at[:, :c].set(params["wf"][:, h:].T)
    bfp = jnp.full((1, C_PAD), -1e30, jnp.float32).at[:, :c].set(params["bf"])

    def fullblock(shape):
        return pl.BlockSpec(shape, lambda i: (0, 0))

    logits_pad, loss = pl.pallas_call(
        fused_gcn_kernel,
        out_shape=(jax.ShapeDtypeStruct((e, C_PAD), jnp.float32),
                   jax.ShapeDtypeStruct((1, 1), jnp.float32)),
        grid=(1,),
        in_specs=[
            fullblock((e, 3)),                 # packed row|col|label
            fullblock((n, f)),                 # features
            fullblock((f, h)),                 # W1^T
            fullblock((1, h)),                 # b1
            fullblock((h, h)),                 # W2^T
            fullblock((1, h)),                 # b2
            fullblock((h, C_PAD)),             # Wf_row^T (lane-padded)
            fullblock((h, C_PAD)),             # Wf_col^T (lane-padded)
            fullblock((1, C_PAD)),             # bf (lane-padded, -1e30 tail)
        ],
        out_specs=(fullblock((e, C_PAD)),
                   fullblock((1, 1))),
        compiler_params=pltpu.CompilerParams(
            dimension_semantics=("arbitrary",)),
        # TODO(synk): when a row-block grid is added, mark that axis "parallel"
        # so v7x's second TensorCore is used, and raise vmem_limit_bytes there.
    )(edge_data, features, w1t, params["b1"], w2t, params["b2"], wfr, wfc, bfp)

    return loss[0, 0], logits_pad[:, :c]


# ------------------------- pure-JAX reference (sanity) -------------------------

def gcn_reference(params, index, label, features):
    row, col = index
    n = features.shape[0]
    loops = jnp.arange(n, dtype=row.dtype)
    row_f = jnp.concatenate([row, loops])
    col_f = jnp.concatenate([col, loops])
    deg = jnp.zeros((n,), jnp.float32).at[row_f].add(1.0)
    dinv = deg ** -0.5
    norm = dinv[row_f] * dinv[col_f]
    m = jnp.zeros((n, n), jnp.float32).at[col_f, row_f].add(norm)
    h1 = m @ (features @ params["w1"].T + params["b1"])
    h2 = m @ (h1 @ params["w2"].T + params["b2"])
    x = jnp.concatenate([h2[row], h2[col]], axis=1)
    logits = x @ params["wf"].T + params["bf"]
    lse = jax.nn.logsumexp(logits, axis=-1)
    picked = jnp.take_along_axis(logits, label[:, None], axis=1)[:, 0]
    return jnp.mean(lse - picked), logits


def init_linear(key, out_features, in_features):
    # deterministic torch.nn.Linear-style init: U(-1/sqrt(fan_in), 1/sqrt(fan_in))
    kw, kb = jax.random.split(key)
    bound = 1.0 / jnp.sqrt(jnp.float32(in_features))
    w = jax.random.uniform(kw, (out_features, in_features), jnp.float32,
                           -bound, bound)
    b = jax.random.uniform(kb, (1, out_features), jnp.float32, -bound, bound)
    return w, b


# --------------------------------- main ---------------------------------------

if __name__ == "__main__":
    # GCNConv2 is Linear(nfeature, nhidden) applied to gcn1's output, so (as in
    # the original code) nfeature must equal nhidden.
    N_NODES = 16
    N_FEATURE = 32
    N_HIDDEN = 32
    N_CLASS = 8
    N_EDGES = 8

    key = jax.random.PRNGKey(0)
    k_feat, k_row, k_col, k_lab, k1, k2, k3 = jax.random.split(key, 7)

    features = jax.random.normal(k_feat, (N_NODES, N_FEATURE), jnp.float32)
    row = jax.random.randint(k_row, (N_EDGES,), 0, N_NODES, jnp.int32)
    col = jax.random.randint(k_col, (N_EDGES,), 0, N_NODES, jnp.int32)
    index = (row, col)
    label = jax.random.randint(k_lab, (N_EDGES,), 0, N_CLASS, jnp.int32)
    sentence_mask = jnp.ones((N_EDGES,), jnp.float32)   # API parity (unused)

    w1, b1 = init_linear(k1, N_HIDDEN, N_FEATURE)
    w2, b2 = init_linear(k2, N_HIDDEN, N_FEATURE)
    wf, bf = init_linear(k3, N_CLASS, N_HIDDEN * 2)
    params = {"w1": w1, "b1": b1, "w2": w2, "b2": b2, "wf": wf, "bf": bf}

    loss, logits = jax.jit(gcn_forward)(params, index, label, sentence_mask,
                                        features)
    jax.block_until_ready((loss, logits))

    # sanity check against the pure-JAX reference
    ref_loss, ref_logits = gcn_reference(params, index, label, features)
    jax.block_until_ready((ref_loss, ref_logits))

    assert logits.shape == (N_EDGES, N_CLASS)
    assert loss.shape == ()
    assert bool(jnp.all(jnp.isfinite(logits))) and bool(jnp.isfinite(loss))
    scale = float(jnp.max(jnp.abs(ref_logits))) + 1e-6
    assert float(jnp.max(jnp.abs(logits - ref_logits))) / scale < 5e-2
    assert abs(float(loss) - float(ref_loss)) < 5e-2 * (abs(float(ref_loss)) + 1.0)
    print("KERNEL_OK")
</pallas_src>

<mosaic_0001>
module attributes {stable_mosaic.version = 11 : i64} {
  func.func @fused_gcn_kernel(%arg0: i32, %arg1: memref<8x3xi32, #tpu.memory_space<vmem>>, %arg2: memref<16x32xf32, #tpu.memory_space<vmem>>, %arg3: memref<32x32xf32, #tpu.memory_space<vmem>>, %arg4: memref<1x32xf32, #tpu.memory_space<vmem>>, %arg5: memref<32x32xf32, #tpu.memory_space<vmem>>, %arg6: memref<1x32xf32, #tpu.memory_space<vmem>>, %arg7: memref<32x128xf32, #tpu.memory_space<vmem>>, %arg8: memref<32x128xf32, #tpu.memory_space<vmem>>, %arg9: memref<1x128xf32, #tpu.memory_space<vmem>>, %arg10: memref<8x128xf32, #tpu.memory_space<vmem>>, %arg11: memref<1x1xf32, #tpu.memory_space<vmem>>) attributes {dimension_semantics = [#tpu.dimension_semantics<arbitrary>], iteration_bounds = array<i64: 1>, scalar_prefetch = 0 : i64, scratch_operands = 0 : i64, tpu.core_type = #tpu.core_type<tc>, window_params = [{pipeline_mode = #tpu.pipeline_mode<synchronous>, transform_indices = @transform_0, window_bounds = array<i64: 8, 3>}, {pipeline_mode = #tpu.pipeline_mode<synchronous>, transform_indices = @transform_1, window_bounds = array<i64: 16, 32>}, {pipeline_mode = #tpu.pipeline_mode<synchronous>, transform_indices = @transform_2, window_bounds = array<i64: 32, 32>}, {pipeline_mode = #tpu.pipeline_mode<synchronous>, transform_indices = @transform_3, window_bounds = array<i64: 1, 32>}, {pipeline_mode = #tpu.pipeline_mode<synchronous>, transform_indices = @transform_4, window_bounds = array<i64: 32, 32>}, {pipeline_mode = #tpu.pipeline_mode<synchronous>, transform_indices = @transform_5, window_bounds = array<i64: 1, 32>}, {pipeline_mode = #tpu.pipeline_mode<synchronous>, transform_indices = @transform_6, window_bounds = array<i64: 32, 128>}, {pipeline_mode = #tpu.pipeline_mode<synchronous>, transform_indices = @transform_7, window_bounds = array<i64: 32, 128>}, {pipeline_mode = #tpu.pipeline_mode<synchronous>, transform_indices = @transform_8, window_bounds = array<i64: 1, 128>}, {pipeline_mode = #tpu.pipeline_mode<synchronous>, transform_indices = @transform_9, window_bounds = array<i64: 8, 128>}, {pipeline_mode = #tpu.pipeline_mode<synchronous>, transform_indices = @transform_10, window_bounds = array<i64: 1, 1>}]} {
    %c0 = arith.constant 0 : index
    %c0_0 = arith.constant 0 : index
    %0 = vector.load %arg1[%c0, %c0_0] : memref<8x3xi32, #tpu.memory_space<vmem>>, vector<8x1xi32>
    %c0_1 = arith.constant 0 : index
    %c1 = arith.constant 1 : index
    %1 = vector.load %arg1[%c0_1, %c1] : memref<8x3xi32, #tpu.memory_space<vmem>>, vector<8x1xi32>
    %c0_2 = arith.constant 0 : index
    %c2 = arith.constant 2 : index
    %2 = vector.load %arg1[%c0_2, %c2] : memref<8x3xi32, #tpu.memory_space<vmem>>, vector<8x1xi32>
    %3 = tpu.iota {dimensions = array<i32: 1>} : vector<8x16xi32>
    %4 = vector.broadcast %0 : vector<8x1xi32> to vector<8x16xi32>
    %5 = arith.cmpi eq, %3, %4 : vector<8x16xi32>
    %6 = arith.extui %5 : vector<8x16xi1> to vector<8x16xi32>
    %7 = arith.sitofp %6 : vector<8x16xi32> to vector<8x16xf32>
    %8 = vector.broadcast %1 : vector<8x1xi32> to vector<8x16xi32>
    %9 = arith.cmpi eq, %3, %8 : vector<8x16xi32>
    %10 = arith.extui %9 : vector<8x16xi1> to vector<8x16xi32>
    %11 = arith.sitofp %10 : vector<8x16xi32> to vector<8x16xf32>
    %cst = arith.constant dense<0.000000e+00> : vector<16xf32>
    %12 = vector.multi_reduction <add>, %7, %cst [0] : vector<8x16xf32> to vector<16xf32>
    %13 = vector.shape_cast %12 : vector<16xf32> to vector<1x16xf32>
    %cst_3 = arith.constant 1.000000e+00 : f32
    %14 = vector.broadcast %cst_3 : f32 to vector<1x16xf32>
    %15 = arith.addf %13, %14 : vector<1x16xf32>
    %16 = math.sqrt %15 : vector<1x16xf32>
    %cst_4 = arith.constant 1.000000e+00 : f32
    %17 = vector.broadcast %cst_4 : f32 to vector<1x16xf32>
    %18 = arith.divf %17, %16 : vector<1x16xf32>
    %19 = vector.broadcast %18 : vector<1x16xf32> to vector<8x16xf32>
    %20 = arith.mulf %7, %19 : vector<8x16xf32>
    %21 = vector.broadcast %18 : vector<1x16xf32> to vector<8x16xf32>
    %22 = arith.mulf %11, %21 : vector<8x16xf32>
    %cst_5 = arith.constant dense<0.000000e+00> : vector<16x16xf32>
    %23 = tpu.matmul %22, %20, %cst_5 {dimension_numbers = #tpu.dot_dimension_numbers<[0], [0], [1], [1], [0, 1, 1, 1], [], []>} : vector<8x16xf32>, vector<8x16xf32>, vector<16x16xf32> -> vector<16x16xf32>
    %24 = tpu.iota {dimensions = array<i32: 0>} : vector<16x16xi32>
    %25 = tpu.iota {dimensions = array<i32: 1>} : vector<16x16xi32>
    %26 = arith.cmpi eq, %24, %25 : vector<16x16xi32>
    %27 = arith.extui %26 : vector<16x16xi1> to vector<16x16xi32>
    %28 = arith.sitofp %27 : vector<16x16xi32> to vector<16x16xf32>
    %29 = arith.mulf %18, %18 : vector<1x16xf32>
    %30 = vector.broadcast %29 : vector<1x16xf32> to vector<16x16xf32>
    %31 = arith.mulf %28, %30 : vector<16x16xf32>
    %32 = arith.addf %23, %31 : vector<16x16xf32>
    %c0_6 = arith.constant 0 : index
    %c0_7 = arith.constant 0 : index
    %33 = vector.load %arg2[%c0_6, %c0_7] : memref<16x32xf32, #tpu.memory_space<vmem>>, vector<16x32xf32>
    %c0_8 = arith.constant 0 : index
    %c0_9 = arith.constant 0 : index
    %34 = vector.load %arg3[%c0_8, %c0_9] : memref<32x32xf32, #tpu.memory_space<vmem>>, vector<32x32xf32>
    %cst_10 = arith.constant dense<0.000000e+00> : vector<16x32xf32>
    %35 = tpu.matmul %33, %34, %cst_10 {dimension_numbers = #tpu.dot_dimension_numbers<[1], [0], [0], [1], [0, 0, 1, 1], [], []>} : vector<16x32xf32>, vector<32x32xf32>, vector<16x32xf32> -> vector<16x32xf32>
    %c0_11 = arith.constant 0 : index
    %c0_12 = arith.constant 0 : index
    %36 = vector.load %arg4[%c0_11, %c0_12] : memref<1x32xf32, #tpu.memory_space<vmem>>, vector<1x32xf32>
    %37 = vector.broadcast %36 : vector<1x32xf32> to vector<16x32xf32>
    %38 = arith.addf %35, %37 : vector<16x32xf32>
    %cst_13 = arith.constant dense<0.000000e+00> : vector<16x32xf32>
    %39 = tpu.matmul %32, %38, %cst_13 {dimension_numbers = #tpu.dot_dimension_numbers<[1], [0], [0], [1], [0, 0, 1, 1], [], []>} : vector<16x16xf32>, vector<16x32xf32>, vector<16x32xf32> -> vector<16x32xf32>
    %c0_14 = arith.constant 0 : index
    %c0_15 = arith.constant 0 : index
    %40 = vector.load %arg5[%c0_14, %c0_15] : memref<32x32xf32, #tpu.memory_space<vmem>>, vector<32x32xf32>
    %cst_16 = arith.constant dense<0.000000e+00> : vector<16x32xf32>
    %41 = tpu.matmul %39, %40, %cst_16 {dimension_numbers = #tpu.dot_dimension_numbers<[1], [0], [0], [1], [0, 0, 1, 1], [], []>} : vector<16x32xf32>, vector<32x32xf32>, vector<16x32xf32> -> vector<16x32xf32>
    %c0_17 = arith.constant 0 : index
    %c0_18 = arith.constant 0 : index
    %42 = vector.load %arg6[%c0_17, %c0_18] : memref<1x32xf32, #tpu.memory_space<vmem>>, vector<1x32xf32>
    %43 = vector.broadcast %42 : vector<1x32xf32> to vector<16x32xf32>
    %44 = arith.addf %41, %43 : vector<16x32xf32>
    %cst_19 = arith.constant dense<0.000000e+00> : vector<16x32xf32>
    %45 = tpu.matmul %32, %44, %cst_19 {dimension_numbers = #tpu.dot_dimension_numbers<[1], [0], [0], [1], [0, 0, 1, 1], [], []>} : vector<16x16xf32>, vector<16x32xf32>, vector<16x32xf32> -> vector<16x32xf32>
    %cst_20 = arith.constant dense<0.000000e+00> : vector<8x32xf32>
    %46 = tpu.matmul %7, %45, %cst_20 {dimension_numbers = #tpu.dot_dimension_numbers<[1], [0], [0], [1], [0, 0, 1, 1], [], []>} : vector<8x16xf32>, vector<16x32xf32>, vector<8x32xf32> -> vector<8x32xf32>
    %cst_21 = arith.constant dense<0.000000e+00> : vector<8x32xf32>
    %47 = tpu.matmul %11, %45, %cst_21 {dimension_numbers = #tpu.dot_dimension_numbers<[1], [0], [0], [1], [0, 0, 1, 1], [], []>} : vector<8x16xf32>, vector<16x32xf32>, vector<8x32xf32> -> vector<8x32xf32>
    %c0_22 = arith.constant 0 : index
    %c0_23 = arith.constant 0 : index
    %48 = vector.load %arg7[%c0_22, %c0_23] : memref<32x128xf32, #tpu.memory_space<vmem>>, vector<32x128xf32>
    %cst_24 = arith.constant dense<0.000000e+00> : vector<8x128xf32>
    %49 = tpu.matmul %46, %48, %cst_24 {dimension_numbers = #tpu.dot_dimension_numbers<[1], [0], [0], [1], [0, 0, 1, 1], [], []>} : vector<8x32xf32>, vector<32x128xf32>, vector<8x128xf32> -> vector<8x128xf32>
    %c0_25 = arith.constant 0 : index
    %c0_26 = arith.constant 0 : index
    %50 = vector.load %arg8[%c0_25, %c0_26] : memref<32x128xf32, #tpu.memory_space<vmem>>, vector<32x128xf32>
    %cst_27 = arith.constant dense<0.000000e+00> : vector<8x128xf32>
    %51 = tpu.matmul %47, %50, %cst_27 {dimension_numbers = #tpu.dot_dimension_numbers<[1], [0], [0], [1], [0, 0, 1, 1], [], []>} : vector<8x32xf32>, vector<32x128xf32>, vector<8x128xf32> -> vector<8x128xf32>
    %52 = arith.addf %49, %51 : vector<8x128xf32>
    %c0_28 = arith.constant 0 : index
    %c0_29 = arith.constant 0 : index
    %53 = vector.load %arg9[%c0_28, %c0_29] : memref<1x128xf32, #tpu.memory_space<vmem>>, vector<1x128xf32>
    %54 = vector.broadcast %53 : vector<1x128xf32> to vector<8x128xf32>
    %55 = arith.addf %52, %54 : vector<8x128xf32>
    %c0_30 = arith.constant 0 : index
    %c0_31 = arith.constant 0 : index
    %56 = vector.load %arg10[%c0_30, %c0_31] : memref<8x128xf32, #tpu.memory_space<vmem>>, vector<8x128xf32>
    tpu.vector_store %arg10[%c0_30, %c0_31], %55 {strides = array<i32>} : memref<8x128xf32, #tpu.memory_space<vmem>>, vector<8x128xf32>,
    %57 = tpu.iota {dimensions = array<i32: 1>} : vector<8x128xi32>
    %58 = vector.broadcast %2 : vector<8x1xi32> to vector<8x128xi32>
    %59 = arith.cmpi eq, %57, %58 : vector<8x128xi32>
    %60 = arith.extui %59 : vector<8x128xi1> to vector<8x128xi32>
    %61 = arith.sitofp %60 : vector<8x128xi32> to vector<8x128xf32>
    %cst_32 = arith.constant dense<0xFF800000> : vector<8xf32>
    %62 = vector.multi_reduction <maximumf>, %55, %cst_32 [1] : vector<8x128xf32> to vector<8xf32>
    %63 = vector.shape_cast %62 : vector<8xf32> to vector<8x1xf32>
    %64 = vector.broadcast %63 : vector<8x1xf32> to vector<8x128xf32>
    %65 = arith.subf %55, %64 : vector<8x128xf32>
    %66 = math.exp %65 : vector<8x128xf32>
    %cst_33 = arith.constant dense<0.000000e+00> : vector<8xf32>
    %67 = vector.multi_reduction <add>, %66, %cst_33 [1] : vector<8x128xf32> to vector<8xf32>
    %68 = vector.shape_cast %67 : vector<8xf32> to vector<8x1xf32>
    %69 = math.log %68 : vector<8x1xf32>
    %70 = arith.addf %69, %63 : vector<8x1xf32>
    %71 = arith.mulf %61, %55 : vector<8x128xf32>
    %cst_34 = arith.constant dense<0.000000e+00> : vector<8xf32>
    %72 = vector.multi_reduction <add>, %71, %cst_34 [1] : vector<8x128xf32> to vector<8xf32>
    %73 = vector.shape_cast %72 : vector<8xf32> to vector<8x1xf32>
    %74 = arith.subf %70, %73 : vector<8x1xf32>
    %cst_35 = arith.constant dense<0.000000e+00> : vector<1xf32>
    %75 = vector.multi_reduction <add>, %74, %cst_35 [0] : vector<8x1xf32> to vector<1xf32>
    %76 = vector.shape_cast %75 : vector<1xf32> to vector<1x1xf32>
    %cst_36 = arith.constant 8.000000e+00 : f32
    %77 = vector.broadcast %cst_36 : f32 to vector<1x1xf32>
    %78 = arith.divf %76, %77 : vector<1x1xf32>
    %c0_37 = arith.constant 0 : index
    %c0_38 = arith.constant 0 : index
    %79 = vector.load %arg11[%c0_37, %c0_38] : memref<1x1xf32, #tpu.memory_space<vmem>>, vector<1x1xf32>
    tpu.vector_store %arg11[%c0_37, %c0_38], %78 {strides = array<i32>} : memref<1x1xf32, #tpu.memory_space<vmem>>, vector<1x1xf32>,
    return
  }
  func.func @transform_0(%arg0: i32) -> (i32, i32) {
    %c0_i32 = arith.constant 0 : i32
    %c0_i32_0 = arith.constant 0 : i32
    %c0_i32_1 = arith.constant 0 : i32
    return %c0_i32, %c0_i32_0 : i32, i32
  }
  func.func @transform_1(%arg0: i32) -> (i32, i32) {
    %c0_i32 = arith.constant 0 : i32
    %c0_i32_0 = arith.constant 0 : i32
    %c0_i32_1 = arith.constant 0 : i32
    return %c0_i32, %c0_i32_0 : i32, i32
  }
  func.func @transform_2(%arg0: i32) -> (i32, i32) {
    %c0_i32 = arith.constant 0 : i32
    %c0_i32_0 = arith.constant 0 : i32
    %c0_i32_1 = arith.constant 0 : i32
    return %c0_i32, %c0_i32_0 : i32, i32
  }
  func.func @transform_3(%arg0: i32) -> (i32, i32) {
    %c0_i32 = arith.constant 0 : i32
    %c0_i32_0 = arith.constant 0 : i32
    %c0_i32_1 = arith.constant 0 : i32
    return %c0_i32, %c0_i32_0 : i32, i32
  }
  func.func @transform_4(%arg0: i32) -> (i32, i32) {
    %c0_i32 = arith.constant 0 : i32
    %c0_i32_0 = arith.constant 0 : i32
    %c0_i32_1 = arith.constant 0 : i32
    return %c0_i32, %c0_i32_0 : i32, i32
  }
  func.func @transform_5(%arg0: i32) -> (i32, i32) {
    %c0_i32 = arith.constant 0 : i32
    %c0_i32_0 = arith.constant 0 : i32
    %c0_i32_1 = arith.constant 0 : i32
    return %c0_i32, %c0_i32_0 : i32, i32
  }
  func.func @transform_6(%arg0: i32) -> (i32, i32) {
    %c0_i32 = arith.constant 0 : i32
    %c0_i32_0 = arith.constant 0 : i32
    %c0_i32_1 = arith.constant 0 : i32
    return %c0_i32, %c0_i32_0 : i32, i32
  }
  func.func @transform_7(%arg0: i32) -> (i32, i32) {
    %c0_i32 = arith.constant 0 : i32
    %c0_i32_0 = arith.constant 0 : i32
    %c0_i32_1 = arith.constant 0 : i32
    return %c0_i32, %c0_i32_0 : i32, i32
  }
  func.func @transform_8(%arg0: i32) -> (i32, i32) {
    %c0_i32 = arith.constant 0 : i32
    %c0_i32_0 = arith.constant 0 : i32
    %c0_i32_1 = arith.constant 0 : i32
    return %c0_i32, %c0_i32_0 : i32, i32
  }
  func.func @transform_9(%arg0: i32) -> (i32, i32) {
    %c0_i32 = arith.constant 0 : i32
    %c0_i32_0 = arith.constant 0 : i32
    %c0_i32_1 = arith.constant 0 : i32
    return %c0_i32, %c0_i32_0 : i32, i32
  }
  func.func @transform_10(%arg0: i32) -> (i32, i32) {
    %c0_i32 = arith.constant 0 : i32
    %c0_i32_0 = arith.constant 0 : i32
    %c0_i32_1 = arith.constant 0 : i32
    return %c0_i32, %c0_i32_0 : i32, i32
  }
}

</mosaic_0001>

<bundles_post_ra>
// kernel: gcn_forward.1
= control target key start
LH: loop header
LB: loop body
LE: loop exit
PB: predicated region body
PF: predicated region fallthrough
CT: control target
= control target key end

     0   :  { %16 = vsyncpa [#allocation3], 0  ;;  %s1354_s0 = inlined_call_operand.vmem [shape: s32[8,3], index: 0, kind: input, shape index: {}]   ;;  %s1355_s1 = inlined_call_operand.vmem [shape: f32[16,32], index: 1, kind: input, shape index: {}]   ;;  %s1356_s2 = inlined_call_operand.vmem [shape: f32[32,32], index: 2, kind: input, shape index: {}]   ;;  %s1357_s3 = inlined_call_operand.vmem [shape: f32[1,32], index: 3, kind: input, shape index: {}]   ;;  %s1358_s4 = inlined_call_operand.vmem [shape: f32[32,32], index: 4, kind: input, shape index: {}]   ;;  %s1359_s5 = inlined_call_operand.vmem [shape: f32[1,32], index: 5, kind: input, shape index: {}]   ;;  %s1360_s6 = inlined_call_operand.vmem [shape: f32[32,128], index: 6, kind: input, shape index: {}]   ;;  %s1361_s7 = inlined_call_operand.vmem [shape: f32[32,128], index: 7, kind: input, shape index: {}]   ;;  %s1362_s8 = inlined_call_operand.vmem [shape: f32[1,128], index: 8, kind: input, shape index: {}]   ;;  %s1363_s9 = inlined_call_operand.hbm [shape: f32[8,128], index: 9, kind: output, shape index: {0}]   ;;  %s1364_s10 = inlined_call_operand.hbm [shape: f32[1,1], index: 10, kind: output, shape index: {1}]  }
   0x1   :  { %v1220_v0 = vld [vmem:[%s1354_s0] sm:$0xff] }
   0x2   :  { %17 = vsyncpa [#allocation5], 0  ;;  %v1154_v1 = vmov 0   ;;  %v1155_v2 = vmov 1   ;;  %v199_v3 = vld [vmem:[%s1356_s2] sm:$0xff]  ;;  %v200_v4 = vld [vmem:[%s1356_s2 + $0x8] sm:$0xff]  ;;  %v37_v11 = vlaneseq }
   0x3   :  { %1095 = vset.pattern.permute.xlu0 %v1154_v1  ;;  %v201_v5 = vld [vmem:[%s1356_s2 + $0x10] sm:$0xff]  ;;  %vm210_vm0 = vcmask 261120   ;;  %v1045_v6 = vpack.c.bf16 %v200_v4, %v199_v3  ;;  %v202_v7 = vld [vmem:[%s1356_s2 + $0x18] sm:$0xff]  ;;  %v197_v8 = vld [vmem:[%s1355_s1] sm:$0xff]  ;;  %vm51_vm1 = vcmask 130048   ;;  %v1156_v14 = vmov 0.0  }
   0x4   :  { %40 = vperm.xlu0 %1095, %v1220_v0   ;;  %v1049_v9 = vpack.c.bf16 %v202_v7, %v201_v5  ;;  %981 = vmatprep.mubr.msk.f32.mxu1 %vm210_vm0, %v197_v8  ;;  %v198_v10 = vld [vmem:[%s1355_s1 + $0x8] sm:$0xff]  ;;  %v1244_v12 = vand.u32 127, %v37_v11  ;;  %v72_v29 = vshrl.u32 %v37_v11, 7  ;;  %v913_v41 = vld [vmem:[%s1357_s3] ss:$0 sm:$0xff]  ;;  %vm115_vm8 = vcmask 64512  }
   0x5   :  { %1046 = vmatprep.subr.bf16.mxu1 %v1045_v6  ;;  %v373_v49 = vld [vmem:[%s1358_s4] sm:$0xff]  ;;  %v374_v50 = vld [vmem:[%s1358_s4 + $0x8] sm:$0xff]  ;;  %v375_v53 = vld [vmem:[%s1358_s4 + $0x10] sm:$0xff]  ;;  %v1157_v4 = vmov 0.0|0.0   ;;  %vm1158_vm9 = vmmov 0   ;;  %s1160_s26 = smov [#allocation2]  }
   0x6   :  { %1048 = vmatpush3.bf16.msra.mxu1 %v1045_v6  ;;  %v73_v31 = vadd.s32 8, %v72_v29  ;;  %vm74_vm7 = vcmp.eq.s32.totalorder %v72_v29, %v1244_v12  ;;  %v1057_v51 = vpack.c.bf16 %v374_v50, %v373_v49  ;;  %v376_v54 = vld [vmem:[%s1358_s4 + $0x18] sm:$0xff]  ;;  %v918_v61 = vld [vmem:[%s1359_s5] ss:$0 sm:$0xff]  ;;  %v691_v8 = vld [vmem:[%s1361_s7 + $0x8] sm:$0xff] }
   0x7   :  { %1050 = vmatprep.subr.bf16.mxu1 %v1049_v9  ;;  %v909_v35 = vsel %vm74_vm7, 1.0, %v1156_v14  ;;  %v1061_v58 = vpack.c.bf16 %v376_v54, %v375_v53  ;;  %v690_v6 = vld [vmem:[%s1361_s7] sm:$0xff] }
   0x8   :  { %1096 = vset.pattern.permute.xlu0 %v1155_v2  ;;  %vm75_vm6 = vcmp.eq.s32.totalorder %v73_v31, %v1244_v12 }
   0x9   :  { %46 = vperm.xlu0 %1096, %v1220_v0   ;;  %v910_v34 = vsel %vm75_vm6, 1.0, %v1156_v14 }
   0xa   :  { %1052 = vmatpush3.bf16.msra.mxu1 %v1049_v9  ;;  %v686_v9 = vld [vmem:[%s1360_s6] sm:$0xff] }
   0xd   :  { %982 = vmatmul.mubr.msk.f32.vlgmr.msra.gmra.mrb[0].mxu1 %vm210_vm0, %v198_v10  ;;  %v687_v10 = vld [vmem:[%s1360_s6 + $0x8] sm:$0xff] }
  0x83   :  { %v41_v13 = vpop.permute.xlu0 %40 }
  0x84   :  { %vm42_vm2 = vcmp.eq.s32.totalorder %v1244_v12, %v41_v13  ;;  %v1076_v13 = vpack.c.bf16 %v691_v8, %v690_v6 }
  0x85   :  { %v1248_v15 = vsel %vm42_vm2, 1.0, %v1156_v14 }
  0x86   :  { %v52_v16 = vsel %vm51_vm1, %v1248_v15, 0.0 }
  0x87   :  { %v53_v17 = vrot.slane %v52_v16, 4 }
  0x88   :  { %v47_v30 = vpop.permute.xlu0 %46 }
  0x89   :  { %v54_v18 = vadd.f32 %v53_v17, %v52_v16  ;;  %vm48_vm5 = vcmp.eq.s32.totalorder %v1244_v12, %v47_v30  ;;  %v1082_v16 = vpack.c.bf16 %v687_v10, %v686_v9  ;;  %v692_v17 = vld [vmem:[%s1361_s7 + $0x10] sm:$0xff]  ;;  %v927_v30 = vld [vmem:[%s1362_s8] ss:$0 sm:$0xff]  ;;  %s885_s8 = sshll.u32 %s1160_s26, 4  ;;  %s886_s8 = int_to_ptr.vmem [resolvable:$true] %s885_s8 }
  0x8a   :  { %v1256_v32 = vsel %vm48_vm5, 1.0, %v1156_v14  ;;  %s1106_s27 = scalar_lea.vmem %s886_s8, 128  ;;  %p1111_p1 = scmp.lt.s32.totalorder %s886_s8, %s886_s8 }
  0x8b   :  { %v55_v19 = vrot.slane %v54_v18, 2  ;;  %p1107_p0 = scmp.ne.s32.totalorder %s886_s8, %s1106_s27  ;;  %p1112_p2 = scmp.lt.s32.totalorder %s1106_s27, %s1106_s27 }
  0x8d   :  { %v56_v20 = vadd.f32 %v55_v19, %v54_v18  ;;  %v693_v18 = vld [vmem:[%s1361_s7 + $0x18] sm:$0xff]  ;;  %v688_v19 = vld [vmem:[%s1360_s6 + $0x10] sm:$0xff]  ;;  %p1113_p3 = por %p1112_p2, %p1111_p1 }
  0x8f   :  { %v57_v21 = vrot.slane %v56_v20, 1  ;;  %p1114_p4 = pnand %p1113_p3, %p1107_p0 }
  0x91   :  { %v58_v22 = vadd.f32 %v57_v21, %v56_v20  ;;  %v689_v20 = vld [vmem:[%s1360_s6 + $0x18] sm:$0xff]  ;;  %v1079_v21 = vpack.c.bf16 %v693_v18, %v692_v17 }
  0x93   :  { %v59_v23 = vadd.f32 1.0, %v58_v22  ;;  %v1085_v22 = vpack.c.bf16 %v689_v20, %v688_v19 }
  0x95   :  { %1098 = vrsqrt.f32 %v59_v23  ;;  %vm62_vm3 = vcmp.eq.f32.partialorder %v59_v23, inf  ;;  %v65_v26 = vand.u32 2147483648, %v59_v23  ;;  %vm64_vm4 = vcmp.eq.f32.partialorder %v59_v23, 0.0 }
  0x9f   :  { %v1099_v24 = vpop.eup %1098 }
  0xa0   :  { %v61_v25 = vmul.f32 %v1099_v24, %v59_v23 }
  0xa2   :  { %v63_v27 = vsel %vm62_vm3, %v59_v23, %v61_v25  ;;  %v1159_v23 = vmov 2  }
  0xa3   :  { %v66_v28 = vsel %vm64_vm4, %v65_v26, %v63_v27  ;;  %1097 = vset.pattern.permute.xlu0 %v1159_v23 }
  0xa4   :  { %1100 = vrcp.f32 %v66_v28  ;;  %850 = vperm.xlu0 %1097, %v1220_v0  }
  0xae   :  { %v1101_v33 = vpop.eup %1100 }
  0xaf   :  { %v69_v36 = vmul.f32 %v1101_v33, %v1248_v15  ;;  %v70_v37 = vmul.f32 %v1101_v33, %v1256_v32  ;;  %v80_v38 = vmul.f32 %v1101_v33, %v1101_v33 }
  0xb1   :  { %968 = vmatprep.subr.mxu0 %v69_v36  ;;  %83 = vxpose.xlu1.b32.start.end [1/1] (short) (narrow) %v70_v37, 16  ;;  %v82_v39 = vmul.f32 %v910_v34, %v80_v38  ;;  %v81_v40 = vmul.f32 %v909_v35, %v80_v38 }
  0xb2   :  { %969 = vmatpush3.msra.mxu0 %v69_v36 }
  0xe0   :  { %v983_v42 = vpop.f32.mrb[0].mxu1 }
  0xe1   :  { %v289_v43 = vadd.f32 %v983_v42, %v913_v41  ;;  %v283_v44 = vpop.f32.mrb[1].mxu1 }
  0xe2   :  { %v284_v45 = vadd.f32 %v913_v41, %v283_v44 }
  0xe4   :  { %v1053_v46 = vpack.c.bf16 %v289_v43, %v284_v45 }
  0xe6   :  { %1054 = vmatprep.subr.bf16.mxu0 %v1053_v46 }
 0x123   :  { %v851_v27 = vpop.permute.xlu0 %850 }
 0x124   :  { %vm852_vm10 = vcmp.eq.s32.totalorder %v1244_v12, %v851_v27 }
 0x125   :  { %v928_v34 = vsel %vm852_vm10, 1.0, %v1156_v14 }
 0x131   :  { %v99_v47 = vpop.trf.xlu1 }
 0x132   :  { %970 = vmatprep.mubr.msk.f32.mxu0 %vm115_vm8, %v99_v47 }
 0x135   :  { %v100_v48 = vpop.trf.xlu1 }
 0x136   :  { %971 = vmatmul.mubr.msk.f32.vlgmr.msra.gmra.mrb[0].mxu0 %vm115_vm8, %v100_v48 }
 0x137   :  { %1056 = vmatpush3.bf16.msra.mxu0 %v1053_v46 }
 0x138   :  { %1058 = vmatprep.subr.bf16.mxu0 %v1057_v51 }
 0x209   :  { %v972_v52 = vpop.f32.mrb[0].mxu0 }
 0x20a   :  { %v194_v55 = vadd.f32 %v972_v52, %v82_v39  ;;  %v188_v56 = vpop.f32.mrb[1].mxu0 }
 0x20b   :  { %v189_v57 = vadd.f32 %v188_v56, %v81_v40 }
 0x20d   :  { %988 = vmatprep.mubr.msk.f32.mxu0 %vm51_vm1, %v189_v57  ;;  %1006 = vmatprep.mubr.msk.f32.mxu1 %vm51_vm1, %v189_v57 }
 0x20e   :  { %989 = vmatmul.mubr.msk.f32.vlgmr.msra.gmra.mrb[2].mxu0 %vm51_vm1, %v194_v55 }
 0x20f   :  { %1060 = vmatpush3.bf16.msra.mxu0 %v1057_v51 }
 0x210   :  { %1062 = vmatprep.subr.bf16.mxu0 %v1061_v58 }
 0x213   :  { %1064 = vmatpush3.bf16.msra.mxu0 %v1061_v58 }
 0x214   :  { %1072 = vmatprep.subr.bf16.mxu0 %v1157_v4 }
 0x2e1   :  { %v990_v59 = vpop.f32.mrb[2].mxu0 }
 0x2e2   :  { %v364_v60 = vpop.f32.mrb[3].mxu0 }
 0x2e3   :  { %999 = vmatprep.mubr.msk.f32.mxu0 %vm210_vm0, %v364_v60 }
 0x2e4   :  { %1000 = vmatmul.mubr.msk.f32.vlgmr.msra.gmra.mrb[4].mxu0 %vm210_vm0, %v990_v59 }
 0x2e5   :  { %1020 = vmatprep.mubr.msk.f32.mxu0 %vm1158_vm9, %v1156_v14 }
 0x3b7   :  { %v1001_v62 = vpop.f32.mrb[4].mxu0 }
 0x3b8   :  { %v462_v63 = vadd.f32 %v1001_v62, %v918_v61  ;;  %v456_v1 = vpop.f32.mrb[5].mxu0 }
 0x3b9   :  { %v457_v2 = vadd.f32 %v918_v61, %v456_v1 }
 0x3bb   :  { %v1065_v3 = vpack.c.bf16 %v462_v63, %v457_v2 }
 0x3bd   :  { %1066 = vmatprep.subr.bf16.mxu1 %v1065_v3 }
 0x3be   :  { %1068 = vmatpush3.bf16.msra.mxu1 %v1065_v3 }
 0x3bf   :  { %1069 = vmatprep.subr.bf16.mxu1 %v1157_v4 }
 0x3c1   :  { %1007 = vmatmul.mubr.msk.f32.vlgmr.msra.gmra.mrb[2].mxu1 %vm51_vm1, %v194_v55 }
 0x3c2   :  { %1013 = vmatprep.mubr.msk.f32.mxu1 %vm1158_vm9, %v1156_v14 }
 0x494   :  { %v1008_v5 = vpop.f32.mrb[2].mxu1 }
 0x495   :  { %v531_v7 = vpop.f32.mrb[3].mxu1 }
 0x496   :  { %v1070_v11 = vpack.c.bf16 %v1008_v5, %v531_v7 }
 0x498   :  { %1071 = vmatpush3.bf16.msra.mxu1 %v1070_v11  ;;  %1074 = vmatpush3.bf16.msra.mxu0 %v1070_v11 }
 0x499   :  { %1075 = vmatprep.subr.bf16.mxu1 %v1157_v4  ;;  %1081 = vmatprep.subr.bf16.mxu0 %v1157_v4 }
 0x49b   :  { %1014 = vmatmul.mubr.msk.f32.vlgmr.msra.gmra.mrb[4].mxu1 %vm51_vm1, %v1248_v15  ;;  %1021 = vmatmul.mubr.msk.f32.vlgmr.msra.gmra.mrb[6].mxu0 %vm51_vm1, %v1256_v32 }
 0x49c   :  { %1077 = vmatpush3.bf16.msra.mxu1 %v1076_v13  ;;  %1083 = vmatpush3.bf16.msra.mxu0 %v1082_v16 }
 0x49d   :  { %1078 = vmatprep.subr.bf16.mxu1 %v1157_v4  ;;  %1084 = vmatprep.subr.bf16.mxu0 %v1157_v4 }
 0x49e   :  { %1031 = vmatprep.mubr.msk.f32.mxu1 %vm1158_vm9, %v1156_v14  ;;  %1042 = vmatprep.mubr.msk.f32.mxu0 %vm1158_vm9, %v1156_v14 }
 0x4a0   :  { %1080 = vmatpush3.bf16.msra.mxu1 %v1079_v21  ;;  %1086 = vmatpush3.bf16.msra.mxu0 %v1085_v22 }
 0x56e   :  { %v609_v15 = vpop.f32.mrb[4].mxu1  ;;  %v682_v24 = vpop.f32.mrb[6].mxu0 }
 0x56f   :  { %v1015_v25 = vpop.f32.mrb[5].mxu1  ;;  %v1022_v26 = vpop.f32.mrb[7].mxu0  ;;  %1032 = vmatmul.mubr.msk.f32.vlgmr.msra.gmra.mrb[6].mxu1 %vm210_vm0, %v682_v24  ;;  %1043 = vmatmul.mubr.msk.f32.vlgmr.msra.gmra.mrb[8].mxu0 %vm210_vm0, %v609_v15 }
 0x642   :  { %v763_v28 = vpop.f32.mrb[6].mxu1  ;;  %v836_v29 = vpop.f32.mrb[8].mxu0 }
 0x643   :  { %v837_v31 = vadd.f32 %v836_v29, %v763_v28  ;;  %v1033_v32 = vpop.f32.mrb[7].mxu1  ;;  %v1044_v33 = vpop.f32.mrb[9].mxu0 }
 0x645   :  { %v847_v0 = vadd.f32 %v927_v30, %v837_v31 }
 0x647   :  { %848 = vst [vmem:[#allocation2] sm:$0xff] %v847_v0  ;;  %855 = vmax.xlane.f32.xlu1 %v847_v0  ;;  %v865_v35 = vmul.f32 %v928_v34, %v847_v0 }
 0x64b   :  { %866 = vadd.xlane.f32.xlu1 %v865_v35 }
 0x6d4   :  { %v856_v36 = vpop.xlane.xlu1 %855 }
 0x6d5   :  { %v857_v37 = vsub.f32 %v847_v0, %v856_v36 }
 0x6d7   :  { %v858_v38 = vmul.f32 1.442695, %v857_v37 }
 0x6d9   :  { %1102 = vpow2.f32 %v858_v38 }
 0x6e3   :  { %v1103_v39 = vpop.eup %1102 }
 0x6e4   :  { %860 = vadd.xlane.f32.xlu0 %v1103_v39 }
 0x6e5   :  { %1117 = shalt.err (!%p1114_p4)
}
 0x6e6   :  { %s1118_s3 = scalar_lea.hbm %s1363_s9, 128 }
 0x6e7   :  { %p1119_p5 = scmp.ne.s32.totalorder %s1363_s9, %s1118_s3  ;;  %p1122_p6 = scmp.lt.u32.totalorder %s1118_s3, %s1363_s9 }
 0x6e9   :  { %p1124_p7 = pnand %p1122_p6, %p1119_p5 }
 0x6eb   :  { %1127 = shalt.err (!%p1124_p7)
}
 0x6ec   :  { %888 = dma.vmem_to_hbm [thread:$0]  %s886_s8, 128, %s1363_s9, [#allocation3]   ;;  %v867_v42 = vpop.xlane.xlu1 %866  ;;  %vm877_vm11 = vcmask 0  }
 0x6ed   :  { %s1161_s14 = smov [#allocation4]  }
 0x6ee   :  { %s895_s15 = sshll.u32 %s1161_s14, 4  ;;  %s896_s15 = int_to_ptr.vmem [resolvable:$true] %s895_s15 }
 0x6ef   :  { %s1128_s9 = scalar_lea.vmem %s896_s15, 16  ;;  %s1132_s16 = scalar_lea.vmem %s896_s15, 32 }
 0x6f0   :  { %p1129_p8 = scmp.ne.s32.totalorder %s896_s15, %s1128_s9  ;;  %p1133_p9 = scmp.lt.s32.totalorder %s896_s15, %s896_s15 }
 0x6f1   :  { %p1134_p10 = scmp.lt.s32.totalorder %s1132_s16, %s1128_s9 }
 0x6f3   :  { %p1135_p11 = por %p1134_p10, %p1133_p9 }
 0x6f5   :  { %p1136_p12 = pnand %p1135_p11, %p1129_p8 }
 0x771   :  { %v861_v12 = vpop.xlane.xlu0 %860 }
 0x772   :  { %1104 = vlog2.f32 %v861_v12 }
 0x77c   :  { %v1105_v14 = vpop.eup %1104 }
 0x77d   :  { %v863_v40 = vmul.f32 0.6931472, %v1105_v14 }
 0x77f   :  { %v864_v41 = vadd.f32 %v863_v40, %v856_v36 }
 0x781   :  { %v868_v43 = vsub.f32 %v864_v41, %v867_v42 }
 0x783   :  { %v869_v44 = vrot.slane %v868_v43, 4 }
 0x785   :  { %v870_v45 = vadd.f32 %v869_v44, %v868_v43 }
 0x787   :  { %v871_v46 = vrot.slane %v870_v45, 2 }
 0x789   :  { %v872_v47 = vadd.f32 %v871_v46, %v870_v45 }
 0x78b   :  { %v873_v48 = vrot.slane %v872_v47, 1 }
 0x78d   :  { %v874_v49 = vadd.f32 %v873_v48, %v872_v47 }
 0x78f   :  { %v876_v50 = vmul.f32 0.125, %v874_v49 }
 0x791   :  { %878 = vst.msk [vmem:[#allocation4] sm:$0x1] %vm877_vm11, %v876_v50 }
 0x792   :  { %1139 = shalt.err (!%p1136_p12)
}
 0x793   :  { %s1140_s19 = scalar_lea.hbm %s1364_s10, 16 }
 0x794   :  { %p1141_p13 = scmp.ne.s32.totalorder %s1364_s10, %s1140_s19  ;;  %p1144_p0 = scmp.lt.u32.totalorder %s1140_s19, %s1364_s10 }
 0x796   :  { %p1146_p1 = pnand %p1144_p0, %p1141_p13 }
 0x798   :  { %1149 = shalt.err (!%p1146_p1)
}
 0x799   :  { %898 = dma.vmem_to_hbm [thread:$0]  %s896_s15, 16, %s1364_s10, [#allocation5]  }
 0x79a   :  { %1150 = dma.done.wait [#allocation3], 128  }
 0x79b   :  { %1151 = vsyncadd [#allocation3], 4294967168 }
 0x79c   :  { %1152 = dma.done.wait [#allocation5], 16  }
 0x79d   :  { %1153 = vsyncadd [#allocation5], 4294967280 }
 0x79e   :  { %905 = vsyncpa [#allocation3], 1 }
 0x79f   :  { %906 = vsyncpa [#allocation5], 1 }

</bundles_post_ra>
